<compile_context>
chip_gen: v7x
topology: tpu7x:2x2x1
jax: 0.10.0
libtpu: 0.0.40
codegen_flags: <defaults>
</compile_context>

<pallas_src>
import jax
import jax.numpy as jnp
from jax.experimental import pallas as pl
from jax.experimental.pallas import tpu as pltpu

K_IN = 28 * 28   # 784 (divisible by 8 -> legal sublane dim for the w1 block)
H1 = 512
H2 = 256
TM_MAX = 512     # batch rows per grid step (upper bound)


def _round_up(x, m):
    return ((x + m - 1) // m) * m


def _choose_tm(batch):
    """TM in [8, TM_MAX], multiple of 8; for large batches keep >= 2 grid steps
    so dimension_semantics=('parallel',) can feed both v7x TensorCores."""
    tm = min(TM_MAX, max(8, _round_up(pl.cdiv(batch, 2), 8)))
    return min(tm, _round_up(batch, 8))


def disc_kernel(x_ref, w1_ref, b1_ref, w2_ref, b2_ref, w3_ref, b3_ref, out_ref):
    # x_ref:  (TM, 784) f32  -- cast to bf16 here (hidden under the MXU work)
    # w1_ref: (784, 512) bf16   w2_ref: (512, 256) bf16
    # b1_ref: (1, 512) f32      b2_ref: (1, 256) f32
    # w3_ref: (1, 256) f32 row  b3_ref: (1, 1) f32
    x = x_ref[...].astype(jnp.bfloat16)

    # Linear(784 -> 512) + LeakyReLU(0.2): bf16 MXU matmul, f32 accumulation.
    h1 = jnp.dot(x, w1_ref[...], preferred_element_type=jnp.float32) + b1_ref[...]
    h1 = jnp.where(h1 > 0, h1, 0.2 * h1)

    # Linear(512 -> 256) + LeakyReLU(0.2)
    h2 = jnp.dot(h1.astype(jnp.bfloat16), w2_ref[...],
                 preferred_element_type=jnp.float32) + b2_ref[...]
    h2 = jnp.where(h2 > 0, h2, 0.2 * h2)

    # Linear(256 -> 1): VPU multiply + lane reduction instead of an N=1 matmul.
    h3 = jnp.sum(h2 * w3_ref[...], axis=-1, keepdims=True) + b3_ref[...]

    # Sigmoid (exact reciprocal -- only TM values, cost is negligible).
    out_ref[...] = 1.0 / (1.0 + jnp.exp(-h3))


def init_params(key):
    """Torch nn.Linear-style init (U[-1/sqrt(in), 1/sqrt(in)]).

    Weights are stored as (in_features, out_features); biases as (1, out_features).
    """
    dims = [(K_IN, H1), (H1, H2), (H2, 1)]
    params = []
    for fan_in, fan_out in dims:
        key, kw, kb = jax.random.split(key, 3)
        bound = 1.0 / jnp.sqrt(jnp.float32(fan_in))
        w = jax.random.uniform(kw, (fan_in, fan_out), jnp.float32, -bound, bound)
        b = jax.random.uniform(kb, (1, fan_out), jnp.float32, -bound, bound)
        params += [w, b]
    return tuple(params)


def discriminator_forward(img, params):
    """img: (B, 1, 28, 28) float32 (NCHW, like the torch module). Returns (B, 1) f32."""
    w1, b1, w2, b2, w3, b3 = params
    B = img.shape[0]
    x = img.reshape(B, -1).astype(jnp.float32)          # (B, 784), torch .view

    # One-time (tiny) weight casts; x itself is NOT copied or cast in the wrapper.
    w1_b = w1.astype(jnp.bfloat16)                       # (784, 512)
    w2_b = w2.astype(jnp.bfloat16)                       # (512, 256)
    w3_row = w3.reshape(1, H2).astype(jnp.float32)       # (1, 256) lane-reduce row
    b1_r = b1.reshape(1, H1).astype(jnp.float32)
    b2_r = b2.reshape(1, H2).astype(jnp.float32)
    b3_r = b3.reshape(1, 1).astype(jnp.float32)

    tm = _choose_tm(B)
    nb = pl.cdiv(B, tm)                                  # partial last block handled by Pallas
    resident = lambda i: (0, 0)                          # weights pinned in VMEM across the grid

    flops = 2 * B * (K_IN * H1 + H1 * H2 + H2)
    bytes_accessed = (x.size * 4                         # f32 x read
                      + w1_b.size * 2 + w2_b.size * 2    # bf16 weights
                      + (b1_r.size + b2_r.size + w3_row.size + b3_r.size) * 4
                      + B * 4)                           # f32 output

    out = pl.pallas_call(
        disc_kernel,
        out_shape=jax.ShapeDtypeStruct((B, 1), jnp.float32),
        grid=(nb,),
        in_specs=[
            pl.BlockSpec((tm, K_IN), lambda i: (i, 0)),  # x tiled over the batch (f32)
            pl.BlockSpec((K_IN, H1), resident),          # w1 (bf16)
            pl.BlockSpec((1, H1), resident),             # b1
            pl.BlockSpec((H1, H2), resident),            # w2 (bf16)
            pl.BlockSpec((1, H2), resident),             # b2
            pl.BlockSpec((1, H2), resident),             # w3 row
            pl.BlockSpec((1, 1), resident),              # b3
        ],
        out_specs=pl.BlockSpec((tm, 1), lambda i: (i, 0)),
        compiler_params=pltpu.CompilerParams(
            dimension_semantics=("parallel",)),
        cost_estimate=pl.CostEstimate(
            flops=flops, transcendentals=2 * B, bytes_accessed=bytes_accessed),
    )(x, w1_b, b1_r, w2_b, b2_r, w3_row, b3_r)

    return out


def _reference_forward(img, params):
    """Pure-f32 JAX reference matching the PyTorch module exactly."""
    w1, b1, w2, b2, w3, b3 = params
    B = img.shape[0]
    x = img.reshape(B, -1).astype(jnp.float32)
    h1 = x @ w1 + b1
    h1 = jnp.where(h1 > 0, h1, 0.2 * h1)
    h2 = h1 @ w2 + b2
    h2 = jnp.where(h2 > 0, h2, 0.2 * h2)
    return jax.nn.sigmoid(h2 @ w3 + b3)


if __name__ == "__main__":
    key = jax.random.PRNGKey(0)
    k_img, k_param = jax.random.split(key)

    B = 8
    img = jax.random.normal(k_img, (B, 1, 28, 28), jnp.float32)  # NCHW
    params = init_params(k_param)

    out = jax.block_until_ready(discriminator_forward(img, params))
    ref = _reference_forward(img, params)

    assert out.shape == (B, 1)
    # bf16 matmul operands vs. f32 reference -> loosened tolerance (sigmoid-bounded).
    assert jnp.allclose(out, ref, atol=2e-2, rtol=2e-2), (
        f"max abs err {float(jnp.max(jnp.abs(out - ref)))}")

    print("KERNEL_OK")
</pallas_src>

<mosaic_0001>
module attributes {stable_mosaic.version = 11 : i64} {
  func.func @disc_kernel(%arg0: i32, %arg1: memref<8x784xf32, #tpu.memory_space<vmem>>, %arg2: memref<784x512xbf16, #tpu.memory_space<vmem>>, %arg3: memref<1x512xf32, #tpu.memory_space<vmem>>, %arg4: memref<512x256xbf16, #tpu.memory_space<vmem>>, %arg5: memref<1x256xf32, #tpu.memory_space<vmem>>, %arg6: memref<1x256xf32, #tpu.memory_space<vmem>>, %arg7: memref<1x1xf32, #tpu.memory_space<vmem>>, %arg8: memref<8x1xf32, #tpu.memory_space<vmem>>) attributes {dimension_semantics = [#tpu.dimension_semantics<parallel>], iteration_bounds = array<i64: 1>, scalar_prefetch = 0 : i64, scratch_operands = 0 : i64, tpu.core_type = #tpu.core_type<tc>, window_params = [{transform_indices = @transform_0, window_bounds = array<i64: 8, 784>}, {pipeline_mode = #tpu.pipeline_mode<synchronous>, transform_indices = @transform_1, window_bounds = array<i64: 784, 512>}, {pipeline_mode = #tpu.pipeline_mode<synchronous>, transform_indices = @transform_2, window_bounds = array<i64: 1, 512>}, {pipeline_mode = #tpu.pipeline_mode<synchronous>, transform_indices = @transform_3, window_bounds = array<i64: 512, 256>}, {pipeline_mode = #tpu.pipeline_mode<synchronous>, transform_indices = @transform_4, window_bounds = array<i64: 1, 256>}, {pipeline_mode = #tpu.pipeline_mode<synchronous>, transform_indices = @transform_5, window_bounds = array<i64: 1, 256>}, {pipeline_mode = #tpu.pipeline_mode<synchronous>, transform_indices = @transform_6, window_bounds = array<i64: 1, 1>}, {transform_indices = @transform_7, window_bounds = array<i64: 8, 1>}]} {
    %c0 = arith.constant 0 : index
    %c0_0 = arith.constant 0 : index
    %0 = vector.load %arg1[%c0, %c0_0] : memref<8x784xf32, #tpu.memory_space<vmem>>, vector<8x784xf32>
    %1 = arith.truncf %0 : vector<8x784xf32> to vector<8x784xbf16>
    %c0_1 = arith.constant 0 : index
    %c0_2 = arith.constant 0 : index
    %2 = vector.load %arg2[%c0_1, %c0_2] : memref<784x512xbf16, #tpu.memory_space<vmem>>, vector<784x512xbf16>
    %cst = arith.constant dense<0.000000e+00> : vector<8x512xf32>
    %3 = tpu.matmul %1, %2, %cst {dimension_numbers = #tpu.dot_dimension_numbers<[1], [0], [0], [1], [0, 0, 1, 1], [], []>} : vector<8x784xbf16>, vector<784x512xbf16>, vector<8x512xf32> -> vector<8x512xf32>
    %c0_3 = arith.constant 0 : index
    %c0_4 = arith.constant 0 : index
    %4 = vector.load %arg3[%c0_3, %c0_4] : memref<1x512xf32, #tpu.memory_space<vmem>>, vector<1x512xf32>
    %5 = vector.broadcast %4 : vector<1x512xf32> to vector<8x512xf32>
    %6 = arith.addf %3, %5 : vector<8x512xf32>
    %cst_5 = arith.constant 0.000000e+00 : f32
    %7 = vector.broadcast %cst_5 : f32 to vector<8x512xf32>
    %8 = arith.cmpf ogt, %6, %7 : vector<8x512xf32>
    %cst_6 = arith.constant 2.000000e-01 : f32
    %9 = vector.broadcast %cst_6 : f32 to vector<8x512xf32>
    %10 = arith.mulf %9, %6 : vector<8x512xf32>
    %11 = arith.select %8, %6, %10 : vector<8x512xi1>, vector<8x512xf32>
    %12 = arith.truncf %11 : vector<8x512xf32> to vector<8x512xbf16>
    %c0_7 = arith.constant 0 : index
    %c0_8 = arith.constant 0 : index
    %13 = vector.load %arg4[%c0_7, %c0_8] : memref<512x256xbf16, #tpu.memory_space<vmem>>, vector<512x256xbf16>
    %cst_9 = arith.constant dense<0.000000e+00> : vector<8x256xf32>
    %14 = tpu.matmul %12, %13, %cst_9 {dimension_numbers = #tpu.dot_dimension_numbers<[1], [0], [0], [1], [0, 0, 1, 1], [], []>} : vector<8x512xbf16>, vector<512x256xbf16>, vector<8x256xf32> -> vector<8x256xf32>
    %c0_10 = arith.constant 0 : index
    %c0_11 = arith.constant 0 : index
    %15 = vector.load %arg5[%c0_10, %c0_11] : memref<1x256xf32, #tpu.memory_space<vmem>>, vector<1x256xf32>
    %16 = vector.broadcast %15 : vector<1x256xf32> to vector<8x256xf32>
    %17 = arith.addf %14, %16 : vector<8x256xf32>
    %cst_12 = arith.constant 0.000000e+00 : f32
    %18 = vector.broadcast %cst_12 : f32 to vector<8x256xf32>
    %19 = arith.cmpf ogt, %17, %18 : vector<8x256xf32>
    %cst_13 = arith.constant 2.000000e-01 : f32
    %20 = vector.broadcast %cst_13 : f32 to vector<8x256xf32>
    %21 = arith.mulf %20, %17 : vector<8x256xf32>
    %22 = arith.select %19, %17, %21 : vector<8x256xi1>, vector<8x256xf32>
    %c0_14 = arith.constant 0 : index
    %c0_15 = arith.constant 0 : index
    %23 = vector.load %arg6[%c0_14, %c0_15] : memref<1x256xf32, #tpu.memory_space<vmem>>, vector<1x256xf32>
    %24 = vector.broadcast %23 : vector<1x256xf32> to vector<8x256xf32>
    %25 = arith.mulf %22, %24 : vector<8x256xf32>
    %cst_16 = arith.constant dense<0.000000e+00> : vector<8xf32>
    %26 = vector.multi_reduction <add>, %25, %cst_16 [1] : vector<8x256xf32> to vector<8xf32>
    %27 = vector.shape_cast %26 : vector<8xf32> to vector<8x1xf32>
    %c0_17 = arith.constant 0 : index
    %c0_18 = arith.constant 0 : index
    %28 = vector.load %arg7[%c0_17, %c0_18] : memref<1x1xf32, #tpu.memory_space<vmem>>, vector<1x1xf32>
    %29 = vector.broadcast %28 : vector<1x1xf32> to vector<8x1xf32>
    %30 = arith.addf %27, %29 : vector<8x1xf32>
    %cst_19 = arith.constant 0.000000e+00 : f32
    %31 = vector.broadcast %cst_19 : f32 to vector<8x1xf32>
    %32 = arith.subf %31, %30 : vector<8x1xf32>
    %33 = math.exp %32 : vector<8x1xf32>
    %cst_20 = arith.constant 1.000000e+00 : f32
    %34 = vector.broadcast %cst_20 : f32 to vector<8x1xf32>
    %35 = arith.addf %34, %33 : vector<8x1xf32>
    %cst_21 = arith.constant 1.000000e+00 : f32
    %36 = vector.broadcast %cst_21 : f32 to vector<8x1xf32>
    %37 = arith.divf %36, %35 : vector<8x1xf32>
    %c0_22 = arith.constant 0 : index
    %c0_23 = arith.constant 0 : index
    %38 = vector.load %arg8[%c0_22, %c0_23] : memref<8x1xf32, #tpu.memory_space<vmem>>, vector<8x1xf32>
    tpu.vector_store %arg8[%c0_22, %c0_23], %37 {strides = array<i32>} : memref<8x1xf32, #tpu.memory_space<vmem>>, vector<8x1xf32>,
    return
  }
  func.func @transform_0(%arg0: i32) -> (i32, i32) {
    %c0_i32 = arith.constant 0 : i32
    %c0_i32_0 = arith.constant 0 : i32
    return %arg0, %c0_i32 : i32, i32
  }
  func.func @transform_1(%arg0: i32) -> (i32, i32) {
    %c0_i32 = arith.constant 0 : i32
    %c0_i32_0 = arith.constant 0 : i32
    %c0_i32_1 = arith.constant 0 : i32
    return %c0_i32, %c0_i32_0 : i32, i32
  }
  func.func @transform_2(%arg0: i32) -> (i32, i32) {
    %c0_i32 = arith.constant 0 : i32
    %c0_i32_0 = arith.constant 0 : i32
    %c0_i32_1 = arith.constant 0 : i32
    return %c0_i32, %c0_i32_0 : i32, i32
  }
  func.func @transform_3(%arg0: i32) -> (i32, i32) {
    %c0_i32 = arith.constant 0 : i32
    %c0_i32_0 = arith.constant 0 : i32
    %c0_i32_1 = arith.constant 0 : i32
    return %c0_i32, %c0_i32_0 : i32, i32
  }
  func.func @transform_4(%arg0: i32) -> (i32, i32) {
    %c0_i32 = arith.constant 0 : i32
    %c0_i32_0 = arith.constant 0 : i32
    %c0_i32_1 = arith.constant 0 : i32
    return %c0_i32, %c0_i32_0 : i32, i32
  }
  func.func @transform_5(%arg0: i32) -> (i32, i32) {
    %c0_i32 = arith.constant 0 : i32
    %c0_i32_0 = arith.constant 0 : i32
    %c0_i32_1 = arith.constant 0 : i32
    return %c0_i32, %c0_i32_0 : i32, i32
  }
  func.func @transform_6(%arg0: i32) -> (i32, i32) {
    %c0_i32 = arith.constant 0 : i32
    %c0_i32_0 = arith.constant 0 : i32
    %c0_i32_1 = arith.constant 0 : i32
    return %c0_i32, %c0_i32_0 : i32, i32
  }
  func.func @transform_7(%arg0: i32) -> (i32, i32) {
    %c0_i32 = arith.constant 0 : i32
    %c0_i32_0 = arith.constant 0 : i32
    return %arg0, %c0_i32 : i32, i32
  }
}

</mosaic_0001>

<bundles_post_ra>
// kernel: tpu_custom_call.1
= control target key start
LH: loop header
LB: loop body
LE: loop exit
PB: predicated region body
PF: predicated region fallthrough
CT: control target
= control target key end

     0   :  { %s3071_s0 = inlined_call_operand.hbm [shape: f32[8,784], index: 0, kind: input, shape index: {}]   ;;  %s3072_s1 = inlined_call_operand.hbm [shape: bf16[784,512], index: 1, kind: input, shape index: {}]   ;;  %s3073_s2 = inlined_call_operand.vmem [shape: f32[1,512], index: 2, kind: input, shape index: {}]   ;;  %s3074_s3 = inlined_call_operand.hbm [shape: bf16[512,256], index: 3, kind: input, shape index: {}]   ;;  %s3075_s4 = inlined_call_operand.vmem [shape: f32[1,256], index: 4, kind: input, shape index: {}]   ;;  %s3076_s5 = inlined_call_operand.vmem [shape: f32[1,256], index: 5, kind: input, shape index: {}]   ;;  %s3077_s6 = inlined_call_operand.<no memory space> [shape: f32[1,1], index: 6, kind: input, shape index: {}]   ;;  %s3078_s7 = inlined_call_operand.vmem [shape: f32[8,1], index: 7, kind: output, shape index: {}]  }
   0x1   :  { %v12_v0 = vstv %s3077_s6 }
   0x2   :  { %13 = vst [vmem:[#allocation2] sm:$0x1] %v12_v0 }
   0x3   :  { %14 = vsyncpa [#allocation4], 0 }
   0x4   :  { %15 = vsyncpa [#allocation6], 0  ;;  %s2918_s26 = smov [#allocation5]   ;;  %s2848_s30 = scalar_lea.hbm %s3072_s1, 25088 }
   0x5   :  { %s31_s27 = sshll.u32 %s2918_s26, 4  ;;  %p2849_p0 = scmp.ne.s32.totalorder %s3072_s1, %s2848_s30  ;;  %s32_s27 = int_to_ptr.vmem [resolvable:$true] %s31_s27 }
   0x6   :  { %p2852_p1 = scmp.lt.u32.totalorder %s2848_s30, %s3072_s1 }
   0x8   :  { %p2854_p2 = pnand %p2852_p1, %p2849_p0 }
   0xa   :  { %2857 = shalt.err (!%p2854_p2)
}
   0xb   :  { %s2858_s6 = scalar_lea.vmem %s32_s27, 25088  ;;  %p2863_p4 = scmp.lt.s32.totalorder %s32_s27, %s32_s27 }
   0xc   :  { %p2859_p3 = scmp.ne.s32.totalorder %s32_s27, %s2858_s6  ;;  %p2864_p5 = scmp.lt.s32.totalorder %s2858_s6, %s2858_s6 }
   0xe   :  { %p2865_p6 = por %p2864_p5, %p2863_p4 }
  0x10   :  { %p2866_p7 = pnand %p2865_p6, %p2859_p3 }
  0x12   :  { %2869 = shalt.err (!%p2866_p7)
}
  0x13   :  { %s2919_s12 = smov 256   ;;  %s2920_s13 = smov 16  }
  0x14   :  { %37 = dma.hbm_to_vmem [thread:$0]  %s3072_s1, 25088, %s32_s27, [#allocation6], %s2919_s12, %s2919_s12, %s2920_s13  }
  0x15   :  { %s2921_s16 = smov [#allocation3]   ;;  %s2922_s18 = smov [#allocation7]  }
  0x16   :  { %s22_s17 = sshll.u32 %s2921_s16, 4  ;;  %s45_s19 = sshll.u32 %s2922_s18, 4  ;;  %s23_s17 = int_to_ptr.vmem [resolvable:$true] %s22_s17  ;;  %s46_s19 = int_to_ptr.vmem [resolvable:$true] %s45_s19 }
  0x17   :  { %s2870_s22 = scalar_lea.hbm %s3071_s0, 896 }
  0x18   :  { %p2871_p8 = scmp.ne.s32.totalorder %s3071_s0, %s2870_s22  ;;  %p2874_p9 = scmp.lt.u32.totalorder %s2870_s22, %s3071_s0 }
  0x1a   :  { %p2876_p10 = pnand %p2874_p9, %p2871_p8 }
  0x1c   :  { %2879 = shalt.err (!%p2876_p10)
}
  0x1d   :  { %s2880_s1 = scalar_lea.vmem %s23_s17, 896  ;;  %p2885_p12 = scmp.lt.s32.totalorder %s23_s17, %s23_s17 }
  0x1e   :  { %p2881_p11 = scmp.ne.s32.totalorder %s23_s17, %s2880_s1  ;;  %p2886_p13 = scmp.lt.s32.totalorder %s2880_s1, %s2880_s1 }
  0x20   :  { %p2887_p0 = por %p2886_p13, %p2885_p12 }
  0x22   :  { %p2888_p1 = pnand %p2887_p0, %p2881_p11 }
  0x24   :  { %2891 = shalt.err (!%p2888_p1)
}
  0x25   :  { %25 = dma.hbm_to_vmem [thread:$0]  %s3071_s0, 896, %s23_s17, [#allocation4]  }
  0x26   :  { %s2892_s8 = scalar_lea.hbm %s3074_s3, 8192 }
  0x27   :  { %p2893_p2 = scmp.ne.s32.totalorder %s3074_s3, %s2892_s8  ;;  %p2896_p3 = scmp.lt.u32.totalorder %s2892_s8, %s3074_s3 }
  0x29   :  { %p2898_p4 = pnand %p2896_p3, %p2893_p2 }
  0x2b   :  { %2901 = shalt.err (!%p2898_p4)
}
  0x2c   :  { %s2902_s12 = scalar_lea.vmem %s46_s19, 8192  ;;  %p2907_p6 = scmp.lt.s32.totalorder %s46_s19, %s46_s19 }
  0x2d   :  { %p2903_p5 = scmp.ne.s32.totalorder %s46_s19, %s2902_s12  ;;  %p2908_p7 = scmp.lt.s32.totalorder %s2902_s12, %s2902_s12 }
  0x2f   :  { %p2909_p8 = por %p2908_p7, %p2907_p6 }
  0x31   :  { %p2910_p9 = pnand %p2909_p8, %p2903_p5 }
  0x33   :  { %2913 = shalt.err (!%p2910_p9)
}
  0x34   :  { %s2923_s0 = smov 128   ;;  %s2924_s13 = smov 8  }
  0x35   :  { %51 = dma.hbm_to_vmem [thread:$0]  %s3074_s3, 8192, %s46_s19, [#allocation6], %s2923_s0, %s2923_s0, %s2924_s13  }
  0x36   :  { %2914 = dma.done.wait [#allocation4], 896  }
  0x37   :  { %2915 = vsyncadd [#allocation4], 4294966400 }
  0x38   :  { %2916 = dma.done.wait [#allocation6], 33280  }
  0x39   :  { %2917 = vsyncadd [#allocation6], 4294934016  ;;  %v2454_v1 = vld [vmem:[#allocation5 + $0x4] ss:$16 sps:$4 sm:$0xff]   ;;  %v2458_v3 = vld [vmem:[#allocation5] ss:$16 sps:$4 sm:$0xff]  }
  0x3a   :  { %v2456_v2 = vld [vmem:[#allocation5 + $0x204] ss:$16 sps:$4 sm:$0xff]   ;;  %1284 = vmatprep.subr.bf16.mxu1 %v2454_v1  ;;  %v2459_v4 = vld [vmem:[#allocation5 + $0x200] ss:$16 sps:$4 sm:$0xff]   ;;  %vm1280_vm0 = vcmask 130048   ;;  %vm2143_vm7 = vcmask 7168  }
  0x3b   :  { %1325 = vmatprep.subr.bf16.mxu0 %v2456_v2  ;;  %v2460_v5 = vld [vmem:[#allocation5 + $0x24] ss:$16 sps:$4 sm:$0xff]   ;;  %1285 = vmatpush1.bf16.msra.mxu1 %v2458_v3  ;;  %v2464_v7 = vld [vmem:[#allocation5 + $0x20] ss:$16 sps:$4 sm:$0xff]  }
  0x3c   :  { %1326 = vmatpush1.bf16.msra.mxu0 %v2459_v4  ;;  %v2462_v6 = vld [vmem:[#allocation5 + $0x224] ss:$16 sps:$4 sm:$0xff]   ;;  %1286 = vmatprep.subr.bf16.mxu1 %v2460_v5  ;;  %v2465_v8 = vld [vmem:[#allocation5 + $0x220] ss:$16 sps:$4 sm:$0xff]   ;;  %v68_v5 = vld [vmem:[#allocation3] sm:$0xff] }
  0x3d   :  { %1327 = vmatprep.subr.bf16.mxu0 %v2462_v6  ;;  %v2466_v9 = vld [vmem:[#allocation5 + $0x44] ss:$16 sps:$4 sm:$0xff]   ;;  %v2470_v11 = vld [vmem:[#allocation5 + $0x40] ss:$16 sps:$4 sm:$0xff]  }
  0x3e   :  { %v2468_v10 = vld [vmem:[#allocation5 + $0x244] ss:$16 sps:$4 sm:$0xff]   ;;  %v2471_v12 = vld [vmem:[#allocation5 + $0x240] ss:$16 sps:$4 sm:$0xff]  }
  0x3f   :  { %1287 = vmatpush1.bf16.msra.mxu1 %v2464_v7  ;;  %v2472_v13 = vld [vmem:[#allocation5 + $0x64] ss:$16 sps:$4 sm:$0xff]   ;;  %v2476_v15 = vld [vmem:[#allocation5 + $0x60] ss:$16 sps:$4 sm:$0xff]   ;;  %v70_v7 = vld [vmem:[#allocation3 + $0x10] sm:$0xff] }
  0x40   :  { %1328 = vmatpush1.bf16.msra.mxu0 %v2465_v8  ;;  %1288 = vmatprep.subr.bf16.mxu1 %v2466_v9  ;;  %v2474_v14 = vld [vmem:[#allocation5 + $0x264] ss:$16 sps:$4 sm:$0xff]   ;;  %v2477_v16 = vld [vmem:[#allocation5 + $0x260] ss:$16 sps:$4 sm:$0xff]   ;;  %v2555_v8 = vld [vmem:[#allocation5 + $0xc] ss:$16 sps:$4 sm:$0xff]   ;;  %v3011_v9 = vpack.c.bf16 %v68_v5, %v68_v5 }
  0x41   :  { %1329 = vmatprep.subr.bf16.mxu0 %v2468_v10  ;;  %v2478_v17 = vld [vmem:[#allocation5 + $0x84] ss:$16 sps:$4 sm:$0xff]   ;;  %v2482_v19 = vld [vmem:[#allocation5 + $0x80] ss:$16 sps:$4 sm:$0xff]   ;;  %v2639_v5 = vld [vmem:[#allocation5 + $0x1cc] ss:$16 sps:$4 sm:$0xff]  }
  0x42   :  { %v2480_v18 = vld [vmem:[#allocation5 + $0x284] ss:$16 sps:$4 sm:$0xff]   ;;  %v2483_v20 = vld [vmem:[#allocation5 + $0x280] ss:$16 sps:$4 sm:$0xff]  }
  0x43   :  { %1289 = vmatpush1.bf16.msra.mxu1 %v2470_v11  ;;  %v2484_v21 = vld [vmem:[#allocation5 + $0xa4] ss:$16 sps:$4 sm:$0xff]   ;;  %v2488_v23 = vld [vmem:[#allocation5 + $0xa0] ss:$16 sps:$4 sm:$0xff]   ;;  %v2553_v11 = vld [vmem:[#allocation5 + $0x8] ss:$16 sps:$4 sm:$0xff]  }
  0x44   :  { %1330 = vmatpush1.bf16.msra.mxu0 %v2471_v12  ;;  %1290 = vmatprep.subr.bf16.mxu1 %v2472_v13  ;;  %v2486_v22 = vld [vmem:[#allocation5 + $0x2a4] ss:$16 sps:$4 sm:$0xff]   ;;  %v2489_v24 = vld [vmem:[#allocation5 + $0x2a0] ss:$16 sps:$4 sm:$0xff]   ;;  %v3013_v12 = vpack.c.bf16 %v70_v7, %v70_v7  ;;  %v2637_v7 = vld [vmem:[#allocation5 + $0x1c8] ss:$16 sps:$4 sm:$0xff]  }
  0x45   :  { %1331 = vmatprep.subr.bf16.mxu0 %v2474_v14  ;;  %v2490_v25 = vld [vmem:[#allocation5 + $0xc4] ss:$16 sps:$4 sm:$0xff]   ;;  %v2494_v27 = vld [vmem:[#allocation5 + $0xc0] ss:$16 sps:$4 sm:$0xff]   ;;  %v2561_v14 = vld [vmem:[#allocation5 + $0x2c] ss:$16 sps:$4 sm:$0xff]  }
  0x46   :  { %v2492_v26 = vld [vmem:[#allocation5 + $0x2c4] ss:$16 sps:$4 sm:$0xff]   ;;  %v2495_v28 = vld [vmem:[#allocation5 + $0x2c0] ss:$16 sps:$4 sm:$0xff]  }
  0x47   :  { %1291 = vmatpush1.bf16.msra.mxu1 %v2476_v15  ;;  %v2496_v29 = vld [vmem:[#allocation5 + $0xe4] ss:$16 sps:$4 sm:$0xff]   ;;  %v2500_v31 = vld [vmem:[#allocation5 + $0xe0] ss:$16 sps:$4 sm:$0xff]  }
  0x48   :  { %1332 = vmatpush1.bf16.msra.mxu0 %v2477_v16  ;;  %1292 = vmatprep.subr.bf16.mxu1 %v2478_v17  ;;  %v2498_v30 = vld [vmem:[#allocation5 + $0x2e4] ss:$16 sps:$4 sm:$0xff]   ;;  %v2501_v32 = vld [vmem:[#allocation5 + $0x2e0] ss:$16 sps:$4 sm:$0xff]   ;;  %v2559_v16 = vld [vmem:[#allocation5 + $0x28] ss:$16 sps:$4 sm:$0xff]  }
  0x49   :  { %1333 = vmatprep.subr.bf16.mxu0 %v2480_v18  ;;  %v2502_v33 = vld [vmem:[#allocation5 + $0x104] ss:$16 sps:$4 sm:$0xff]   ;;  %v2506_v35 = vld [vmem:[#allocation5 + $0x100] ss:$16 sps:$4 sm:$0xff]   ;;  %v2567_v18 = vld [vmem:[#allocation5 + $0x4c] ss:$16 sps:$4 sm:$0xff]  }
  0x4a   :  { %v2504_v34 = vld [vmem:[#allocation5 + $0x304] ss:$16 sps:$4 sm:$0xff]   ;;  %v2507_v36 = vld [vmem:[#allocation5 + $0x300] ss:$16 sps:$4 sm:$0xff]  }
  0x4b   :  { %1293 = vmatpush1.bf16.msra.mxu1 %v2482_v19  ;;  %v2508_v37 = vld [vmem:[#allocation5 + $0x124] ss:$16 sps:$4 sm:$0xff]   ;;  %v2512_v39 = vld [vmem:[#allocation5 + $0x120] ss:$16 sps:$4 sm:$0xff]  }
  0x4c   :  { %1334 = vmatpush1.bf16.msra.mxu0 %v2483_v20  ;;  %1294 = vmatprep.subr.bf16.mxu1 %v2484_v21  ;;  %v2510_v38 = vld [vmem:[#allocation5 + $0x324] ss:$16 sps:$4 sm:$0xff]   ;;  %v2513_v40 = vld [vmem:[#allocation5 + $0x320] ss:$16 sps:$4 sm:$0xff]   ;;  %v2565_v20 = vld [vmem:[#allocation5 + $0x48] ss:$16 sps:$4 sm:$0xff]  }
  0x4d   :  { %1335 = vmatprep.subr.bf16.mxu0 %v2486_v22  ;;  %v2514_v41 = vld [vmem:[#allocation5 + $0x144] ss:$16 sps:$4 sm:$0xff]   ;;  %v2518_v43 = vld [vmem:[#allocation5 + $0x140] ss:$16 sps:$4 sm:$0xff]   ;;  %v2573_v22 = vld [vmem:[#allocation5 + $0x6c] ss:$16 sps:$4 sm:$0xff]  }
  0x4e   :  { %v2516_v42 = vld [vmem:[#allocation5 + $0x344] ss:$16 sps:$4 sm:$0xff]   ;;  %v2519_v44 = vld [vmem:[#allocation5 + $0x340] ss:$16 sps:$4 sm:$0xff]  }
  0x4f   :  { %1295 = vmatpush1.bf16.msra.mxu1 %v2488_v23  ;;  %v2520_v45 = vld [vmem:[#allocation5 + $0x164] ss:$16 sps:$4 sm:$0xff]   ;;  %v2524_v48 = vld [vmem:[#allocation5 + $0x160] ss:$16 sps:$4 sm:$0xff]  }
  0x50   :  { %1336 = vmatpush1.bf16.msra.mxu0 %v2489_v24  ;;  %1296 = vmatprep.subr.bf16.mxu1 %v2490_v25  ;;  %v2522_v46 = vld [vmem:[#allocation5 + $0x364] ss:$16 sps:$4 sm:$0xff]   ;;  %v2525_v51 = vld [vmem:[#allocation5 + $0x360] ss:$16 sps:$4 sm:$0xff]   ;;  %v2571_v24 = vld [vmem:[#allocation5 + $0x68] ss:$16 sps:$4 sm:$0xff]  }
  0x51   :  { %1337 = vmatprep.subr.bf16.mxu0 %v2492_v26  ;;  %v69_v47 = vld [vmem:[#allocation3 + $0x8] sm:$0xff]  ;;  %v71_v50 = vld [vmem:[#allocation3 + $0x18] sm:$0xff]  ;;  %v2579_v26 = vld [vmem:[#allocation5 + $0x8c] ss:$16 sps:$4 sm:$0xff]  }
  0x52   :  { %v3005_v49 = vpack.c.bf16 %v69_v47, %v69_v47  ;;  %v2526_v52 = vld [vmem:[#allocation5 + $0x184] ss:$16 sps:$4 sm:$0xff]   ;;  %v3007_v53 = vpack.c.bf16 %v71_v50, %v71_v50  ;;  %v2530_v55 = vld [vmem:[#allocation5 + $0x180] ss:$16 sps:$4 sm:$0xff]   ;;  %v2607_v50 = vld [vmem:[#allocation5 + $0x128] ss:$16 sps:$4 sm:$0xff]  }
  0x53   :  { %1297 = vmatpush1.bf16.msra.mxu1 %v2494_v27  ;;  %v2528_v54 = vld [vmem:[#allocation5 + $0x384] ss:$16 sps:$4 sm:$0xff]   ;;  %v2531_v56 = vld [vmem:[#allocation5 + $0x380] ss:$16 sps:$4 sm:$0xff]  }
  0x54   :  { %1338 = vmatpush1.bf16.msra.mxu0 %v2495_v28  ;;  %1298 = vmatprep.subr.bf16.mxu1 %v2496_v29  ;;  %v2532_v57 = vld [vmem:[#allocation5 + $0x1a4] ss:$16 sps:$4 sm:$0xff]   ;;  %v2536_v59 = vld [vmem:[#allocation5 + $0x1a0] ss:$16 sps:$4 sm:$0xff]   ;;  %v2577_v28 = vld [vmem:[#allocation5 + $0x88] ss:$16 sps:$4 sm:$0xff]  }
  0x55   :  { %1339 = vmatprep.subr.bf16.mxu0 %v2498_v30  ;;  %1316 = vmatprep.mubr.bf16.mxu1 %v3005_v49  ;;  %v2534_v58 = vld [vmem:[#allocation5 + $0x3a4] ss:$16 sps:$4 sm:$0xff]   ;;  %v2537_v60 = vld [vmem:[#allocation5 + $0x3a0] ss:$16 sps:$4 sm:$0xff]   ;;  %v2585_v30 = vld [vmem:[#allocation5 + $0xac] ss:$16 sps:$4 sm:$0xff]  }
  0x56   :  { %1357 = vmatprep.mubr.bf16.mxu0 %v3007_v53  ;;  %v2538_v61 = vld [vmem:[#allocation5 + $0x1c4] ss:$16 sps:$4 sm:$0xff]   ;;  %v2542_v63 = vld [vmem:[#allocation5 + $0x1c0] ss:$16 sps:$4 sm:$0xff]  }
  0x57   :  { %1299 = vmatpush1.bf16.msra.mxu1 %v2500_v31  ;;  %v2540_v62 = vld [vmem:[#allocation5 + $0x3c4] ss:$16 sps:$4 sm:$0xff]   ;;  %v2543_v0 = vld [vmem:[#allocation5 + $0x3c0] ss:$16 sps:$4 sm:$0xff]  }
  0x58   :  { %1340 = vmatpush1.bf16.msra.mxu0 %v2501_v32  ;;  %1300 = vmatprep.subr.bf16.mxu1 %v2502_v33  ;;  %v2544_v1 = vld [vmem:[#allocation5 + $0x1e4] ss:$16 sps:$4 sm:$0xff]   ;;  %v2548_v3 = vld [vmem:[#allocation5 + $0x1e0] ss:$16 sps:$4 sm:$0xff]   ;;  %v2583_v32 = vld [vmem:[#allocation5 + $0xa8] ss:$16 sps:$4 sm:$0xff]  }
  0x59   :  { %1341 = vmatprep.subr.bf16.mxu0 %v2504_v34  ;;  %v2546_v2 = vld [vmem:[#allocation5 + $0x3e4] ss:$16 sps:$4 sm:$0xff]   ;;  %v2549_v4 = vld [vmem:[#allocation5 + $0x3e0] ss:$16 sps:$4 sm:$0xff]   ;;  %v2591_v34 = vld [vmem:[#allocation5 + $0xcc] ss:$16 sps:$4 sm:$0xff]  }
  0x5a   :  { %v2552_v6 = vld [vmem:[#allocation5 + $0x404] ss:$16 sps:$4 sm:$0xff]   ;;  %v2550_v10 = vld [vmem:[#allocation5 + $0x400] ss:$16 sps:$4 sm:$0xff]  }
  0x5b   :  { %1301 = vmatpush1.bf16.msra.mxu1 %v2506_v35  ;;  %v2558_v13 = vld [vmem:[#allocation5 + $0x424] ss:$16 sps:$4 sm:$0xff]   ;;  %v2556_v15 = vld [vmem:[#allocation5 + $0x420] ss:$16 sps:$4 sm:$0xff]  }
  0x5c   :  { %1342 = vmatpush1.bf16.msra.mxu0 %v2507_v36  ;;  %1302 = vmatprep.subr.bf16.mxu1 %v2508_v37  ;;  %v2564_v17 = vld [vmem:[#allocation5 + $0x444] ss:$16 sps:$4 sm:$0xff]   ;;  %v2562_v19 = vld [vmem:[#allocation5 + $0x440] ss:$16 sps:$4 sm:$0xff]  }
  0x5d   :  { %1343 = vmatprep.subr.bf16.mxu0 %v2510_v38  ;;  %v2570_v21 = vld [vmem:[#allocation5 + $0x464] ss:$16 sps:$4 sm:$0xff]   ;;  %v2568_v23 = vld [vmem:[#allocation5 + $0x460] ss:$16 sps:$4 sm:$0xff]   ;;  %v2589_v38 = vld [vmem:[#allocation5 + $0xc8] ss:$16 sps:$4 sm:$0xff]  }
  0x5e   :  { %v2576_v25 = vld [vmem:[#allocation5 + $0x484] ss:$16 sps:$4 sm:$0xff]   ;;  %v2574_v27 = vld [vmem:[#allocation5 + $0x480] ss:$16 sps:$4 sm:$0xff]  }
  0x5f   :  { %1303 = vmatpush1.bf16.msra.mxu1 %v2512_v39  ;;  %v2582_v29 = vld [vmem:[#allocation5 + $0x4a4] ss:$16 sps:$4 sm:$0xff]   ;;  %v2580_v31 = vld [vmem:[#allocation5 + $0x4a0] ss:$16 sps:$4 sm:$0xff]  }
  0x60   :  { %1344 = vmatpush1.bf16.msra.mxu0 %v2513_v40  ;;  %1304 = vmatprep.subr.bf16.mxu1 %v2514_v41  ;;  %v2588_v33 = vld [vmem:[#allocation5 + $0x4c4] ss:$16 sps:$4 sm:$0xff]   ;;  %v2586_v37 = vld [vmem:[#allocation5 + $0x4c0] ss:$16 sps:$4 sm:$0xff]   ;;  %v2597_v40 = vld [vmem:[#allocation5 + $0xec] ss:$16 sps:$4 sm:$0xff]  }
  0x61   :  { %1345 = vmatprep.subr.bf16.mxu0 %v2516_v42  ;;  %v73_v35 = vld [vmem:[#allocation3 + $0x28] sm:$0xff]  ;;  %v2595_v42 = vld [vmem:[#allocation5 + $0xe8] ss:$16 sps:$4 sm:$0xff]  }
  0x62   :  { %v3018_v36 = vpack.c.bf16 %v73_v35, %v73_v35  ;;  %v2594_v39 = vld [vmem:[#allocation5 + $0x4e4] ss:$16 sps:$4 sm:$0xff]   ;;  %v2592_v41 = vld [vmem:[#allocation5 + $0x4e0] ss:$16 sps:$4 sm:$0xff]  }
  0x63   :  { %1305 = vmatpush1.bf16.msra.mxu1 %v2518_v43  ;;  %v2600_v43 = vld [vmem:[#allocation5 + $0x504] ss:$16 sps:$4 sm:$0xff]  }
  0x64   :  { %1346 = vmatpush1.bf16.msra.mxu0 %v2519_v44  ;;  %1306 = vmatprep.subr.bf16.mxu1 %v2520_v45  ;;  %v2603_v44 = vld [vmem:[#allocation5 + $0x10c] ss:$16 sps:$4 sm:$0xff]   ;;  %v2598_v45 = vld [vmem:[#allocation5 + $0x500] ss:$16 sps:$4 sm:$0xff]   ;;  %v2606_v47 = vld [vmem:[#allocation5 + $0x524] ss:$16 sps:$4 sm:$0xff]  }
  0x65   :  { %1347 = vmatprep.subr.bf16.mxu0 %v2522_v46  ;;  %v2601_v46 = vld [vmem:[#allocation5 + $0x108] ss:$16 sps:$4 sm:$0xff]   ;;  %v2750_v35 = vld [vmem:[#allocation7 + $0x4] ss:$8 sps:$4 sm:$0xff]  }
  0x67   :  { %1307 = vmatpush1.bf16.msra.mxu1 %v2524_v48  ;;  %v2609_v48 = vld [vmem:[#allocation5 + $0x12c] ss:$16 sps:$4 sm:$0xff]  }
  0x68   :  { %1348 = vmatpush1.bf16.msra.mxu0 %v2525_v51  ;;  %1308 = vmatprep.subr.bf16.mxu1 %v2526_v52  ;;  %v2612_v51 = vld [vmem:[#allocation5 + $0x544] ss:$16 sps:$4 sm:$0xff]   ;;  %v2615_v52 = vld [vmem:[#allocation5 + $0x14c] ss:$16 sps:$4 sm:$0xff]  }
  0x69   :  { %1349 = vmatprep.subr.bf16.mxu0 %v2528_v54  ;;  %v2610_v54 = vld [vmem:[#allocation5 + $0x540] ss:$16 sps:$4 sm:$0xff]  }
  0x6b   :  { %1309 = vmatpush1.bf16.msra.mxu1 %v2530_v55  ;;  %v2613_v55 = vld [vmem:[#allocation5 + $0x148] ss:$16 sps:$4 sm:$0xff]  }
  0x6c   :  { %1350 = vmatpush1.bf16.msra.mxu0 %v2531_v56  ;;  %1310 = vmatprep.subr.bf16.mxu1 %v2532_v57  ;;  %v2618_v56 = vld [vmem:[#allocation5 + $0x564] ss:$16 sps:$4 sm:$0xff]   ;;  %v2621_v57 = vld [vmem:[#allocation5 + $0x16c] ss:$16 sps:$4 sm:$0xff]  }
  0x6d   :  { %1351 = vmatprep.subr.bf16.mxu0 %v2534_v58  ;;  %v2616_v58 = vld [vmem:[#allocation5 + $0x560] ss:$16 sps:$4 sm:$0xff]  }
  0x6f   :  { %1311 = vmatpush1.bf16.msra.mxu1 %v2536_v59  ;;  %v2619_v59 = vld [vmem:[#allocation5 + $0x168] ss:$16 sps:$4 sm:$0xff]  }
  0x70   :  { %1352 = vmatpush1.bf16.msra.mxu0 %v2537_v60  ;;  %1312 = vmatprep.subr.bf16.mxu1 %v2538_v61  ;;  %v2624_v60 = vld [vmem:[#allocation5 + $0x584] ss:$16 sps:$4 sm:$0xff]   ;;  %v2627_v61 = vld [vmem:[#allocation5 + $0x18c] ss:$16 sps:$4 sm:$0xff]  }
  0x71   :  { %1353 = vmatprep.subr.bf16.mxu0 %v2540_v62  ;;  %v2622_v62 = vld [vmem:[#allocation5 + $0x580] ss:$16 sps:$4 sm:$0xff]  }
  0x73   :  { %1313 = vmatpush1.bf16.msra.mxu1 %v2542_v63  ;;  %v2625_v63 = vld [vmem:[#allocation5 + $0x188] ss:$16 sps:$4 sm:$0xff]  }
  0x74   :  { %1354 = vmatpush1.bf16.msra.mxu0 %v2543_v0  ;;  %1314 = vmatprep.subr.bf16.mxu1 %v2544_v1  ;;  %v2630_v0 = vld [vmem:[#allocation5 + $0x5a4] ss:$16 sps:$4 sm:$0xff]   ;;  %v2633_v1 = vld [vmem:[#allocation5 + $0x1ac] ss:$16 sps:$4 sm:$0xff]  }
  0x75   :  { %1355 = vmatprep.subr.bf16.mxu0 %v2546_v2  ;;  %v2628_v2 = vld [vmem:[#allocation5 + $0x5a0] ss:$16 sps:$4 sm:$0xff]  }
  0x77   :  { %1315 = vmatpush1.bf16.msra.mxu1 %v2548_v3  ;;  %v2631_v3 = vld [vmem:[#allocation5 + $0x1a8] ss:$16 sps:$4 sm:$0xff]  }
  0x78   :  { %1356 = vmatpush1.bf16.msra.mxu0 %v2549_v4  ;;  %1448 = vmatprep.subr.bf16.mxu1 %v2555_v8  ;;  %v2636_v4 = vld [vmem:[#allocation5 + $0x5c4] ss:$16 sps:$4 sm:$0xff]  }
  0x79   :  { %1366 = vmatprep.subr.bf16.mxu0 %v2552_v6  ;;  %v2634_v6 = vld [vmem:[#allocation5 + $0x5c0] ss:$16 sps:$4 sm:$0xff]   ;;  %v2642_v8 = vld [vmem:[#allocation5 + $0x5e4] ss:$16 sps:$4 sm:$0xff]  }
  0x7a   :  { %1317 = vmatmul.mubr.bf16.vlgmr.msra.gmra.mrb[0].mxu1 %v3011_v9 }
  0x7b   :  { %1358 = vmatmul.mubr.bf16.vlgmr.msra.gmra.mrb[0].mxu0 %v3013_v12  ;;  %1449 = vmatpush1.bf16.msra.mxu1 %v2553_v11  ;;  %v2640_v11 = vld [vmem:[#allocation5 + $0x5e0] ss:$16 sps:$4 sm:$0xff]  }
  0x7c   :  { %1367 = vmatpush1.bf16.msra.mxu0 %v2550_v10  ;;  %1450 = vmatprep.subr.bf16.mxu1 %v2561_v14  ;;  %v2645_v10 = vld [vmem:[#allocation5 + $0x1ec] ss:$16 sps:$4 sm:$0xff]  }
  0x7d   :  { %1368 = vmatprep.subr.bf16.mxu0 %v2558_v13  ;;  %1480 = vmatprep.mubr.bf16.mxu1 %v3005_v49  ;;  %v2604_v49 = vld [vmem:[#allocation5 + $0x520] ss:$16 sps:$4 sm:$0xff]   ;;  %v2643_v13 = vld [vmem:[#allocation5 + $0x1e8] ss:$16 sps:$4 sm:$0xff]  }
  0x7e   :  { %1398 = vmatprep.mubr.bf16.mxu0 %v3018_v36  ;;  %v72_v14 = vld [vmem:[#allocation3 + $0x20] sm:$0xff] }
  0x7f   :  { %1451 = vmatpush1.bf16.msra.mxu1 %v2559_v16  ;;  %v2654_v16 = vld [vmem:[#allocation5 + $0x604] ss:$16 sps:$4 sm:$0xff]  }
  0x80   :  { %1369 = vmatpush1.bf16.msra.mxu0 %v2556_v15  ;;  %1452 = vmatprep.subr.bf16.mxu1 %v2567_v18  ;;  %v2648_v15 = vld [vmem:[#allocation5 + $0x20c] ss:$16 sps:$4 sm:$0xff]   ;;  %v2646_v18 = vld [vmem:[#allocation5 + $0x208] ss:$16 sps:$4 sm:$0xff]  }
  0x81   :  { %1370 = vmatprep.subr.bf16.mxu0 %v2564_v17  ;;  %v3021_v17 = vpack.c.bf16 %v72_v14, %v72_v14  ;;  %v2702_v14 = vld [vmem:[#allocation5 + $0x42c] ss:$16 sps:$4 sm:$0xff]  }
  0x83   :  { %1453 = vmatpush1.bf16.msra.mxu1 %v2565_v20  ;;  %v2651_v20 = vld [vmem:[#allocation5 + $0x22c] ss:$16 sps:$4 sm:$0xff]  }
  0x84   :  { %1371 = vmatpush1.bf16.msra.mxu0 %v2562_v19  ;;  %1454 = vmatprep.subr.bf16.mxu1 %v2573_v22  ;;  %v2652_v19 = vld [vmem:[#allocation5 + $0x600] ss:$16 sps:$4 sm:$0xff]   ;;  %v2657_v22 = vld [vmem:[#allocation5 + $0x24c] ss:$16 sps:$4 sm:$0xff]  }
  0x85   :  { %1372 = vmatprep.subr.bf16.mxu0 %v2570_v21  ;;  %v2649_v21 = vld [vmem:[#allocation5 + $0x228] ss:$16 sps:$4 sm:$0xff]  }
  0x87   :  { %1455 = vmatpush1.bf16.msra.mxu1 %v2571_v24  ;;  %v2655_v24 = vld [vmem:[#allocation5 + $0x248] ss:$16 sps:$4 sm:$0xff]  }
  0x88   :  { %1373 = vmatpush1.bf16.msra.mxu0 %v2568_v23  ;;  %1456 = vmatprep.subr.bf16.mxu1 %v2579_v26  ;;  %v2925_v23 = vmov 0   ;;  %v2660_v26 = vld [vmem:[#allocation5 + $0x26c] ss:$16 sps:$4 sm:$0xff]  }
  0x89   :  { %1374 = vmatprep.subr.bf16.mxu0 %v2576_v25  ;;  %v74_v25 = vld [vmem:[#allocation3 + $0x30] sm:$0xff] }
  0x8b   :  { %1457 = vmatpush1.bf16.msra.mxu1 %v2577_v28  ;;  %v3027_v28 = vpack.c.bf16 %v74_v25, %v74_v25  ;;  %v2784_v25 = vld [vmem:[#allocation7 + $0xc0] ss:$8 sps:$4 sm:$0xff]  }
  0x8c   :  { %1375 = vmatpush1.bf16.msra.mxu0 %v2574_v27  ;;  %1458 = vmatprep.subr.bf16.mxu1 %v2585_v30  ;;  %v2658_v27 = vld [vmem:[#allocation5 + $0x268] ss:$16 sps:$4 sm:$0xff]   ;;  %v2666_v30 = vld [vmem:[#allocation5 + $0x2ac] ss:$16 sps:$4 sm:$0xff]  }
  0x8d   :  { %1376 = vmatprep.subr.bf16.mxu0 %v2582_v29  ;;  %v2663_v29 = vld [vmem:[#allocation5 + $0x28c] ss:$16 sps:$4 sm:$0xff]  }
  0x8f   :  { %1459 = vmatpush1.bf16.msra.mxu1 %v2583_v32  ;;  %v2669_v32 = vld [vmem:[#allocation5 + $0x2cc] ss:$16 sps:$4 sm:$0xff]  }
  0x90   :  { %1377 = vmatpush1.bf16.msra.mxu0 %v2580_v31  ;;  %1460 = vmatprep.subr.bf16.mxu1 %v2591_v34  ;;  %v2664_v31 = vld [vmem:[#allocation5 + $0x2a8] ss:$16 sps:$4 sm:$0xff]  }
  0x91   :  { %1378 = vmatprep.subr.bf16.mxu0 %v2588_v33  ;;  %v2672_v33 = vld [vmem:[#allocation5 + $0x2ec] ss:$16 sps:$4 sm:$0xff]   ;;  %v2748_v34 = vld [vmem:[#allocation7] ss:$8 sps:$4 sm:$0xff]  }
  0x93   :  { %1461 = vmatpush1.bf16.msra.mxu1 %v2589_v38  ;;  %v2670_v38 = vld [vmem:[#allocation5 + $0x2e8] ss:$16 sps:$4 sm:$0xff]  }
  0x94   :  { %1379 = vmatpush1.bf16.msra.mxu0 %v2586_v37  ;;  %1462 = vmatprep.subr.bf16.mxu1 %v2597_v40  ;;  %v2753_v37 = vld [vmem:[#allocation7 + $0x14] ss:$8 sps:$4 sm:$0xff]  }
  0x95   :  { %1380 = vmatprep.subr.bf16.mxu0 %v2594_v39  ;;  %v2751_v39 = vld [vmem:[#allocation7 + $0x10] ss:$8 sps:$4 sm:$0xff]   ;;  %v2675_v40 = vld [vmem:[#allocation5 + $0x30c] ss:$16 sps:$4 sm:$0xff]  }
  0x97   :  { %1463 = vmatpush1.bf16.msra.mxu1 %v2595_v42  ;;  %v2673_v42 = vld [vmem:[#allocation5 + $0x308] ss:$16 sps:$4 sm:$0xff]  }
  0x98   :  { %1381 = vmatpush1.bf16.msra.mxu0 %v2592_v41  ;;  %1464 = vmatprep.subr.bf16.mxu1 %v2603_v44  ;;  %v2756_v41 = vld [vmem:[#allocation7 + $0x24] ss:$8 sps:$4 sm:$0xff]  }
  0x99   :  { %1382 = vmatprep.subr.bf16.mxu0 %v2600_v43  ;;  %v2754_v43 = vld [vmem:[#allocation7 + $0x20] ss:$8 sps:$4 sm:$0xff]   ;;  %v2678_v44 = vld [vmem:[#allocation5 + $0x32c] ss:$16 sps:$4 sm:$0xff]  }
  0x9b   :  { %1465 = vmatpush1.bf16.msra.mxu1 %v2601_v46  ;;  %v2676_v46 = vld [vmem:[#allocation5 + $0x328] ss:$16 sps:$4 sm:$0xff]  }
  0x9c   :  { %1383 = vmatpush1.bf16.msra.mxu0 %v2598_v45  ;;  %1466 = vmatprep.subr.bf16.mxu1 %v2609_v48  ;;  %v2759_v45 = vld [vmem:[#allocation7 + $0x34] ss:$8 sps:$4 sm:$0xff]  }
  0x9d   :  { %1384 = vmatprep.subr.bf16.mxu0 %v2606_v47  ;;  %v2757_v47 = vld [vmem:[#allocation7 + $0x30] ss:$8 sps:$4 sm:$0xff]   ;;  %v2681_v48 = vld [vmem:[#allocation5 + $0x34c] ss:$16 sps:$4 sm:$0xff]  }
  0x9f   :  { %1467 = vmatpush1.bf16.msra.mxu1 %v2607_v50  ;;  %v2679_v50 = vld [vmem:[#allocation5 + $0x348] ss:$16 sps:$4 sm:$0xff]  }
  0xa0   :  { %1385 = vmatpush1.bf16.msra.mxu0 %v2604_v49  ;;  %1468 = vmatprep.subr.bf16.mxu1 %v2615_v52  ;;  %v2762_v49 = vld [vmem:[#allocation7 + $0x44] ss:$8 sps:$4 sm:$0xff]  }
  0xa1   :  { %1386 = vmatprep.subr.bf16.mxu0 %v2612_v51  ;;  %v2760_v51 = vld [vmem:[#allocation7 + $0x40] ss:$8 sps:$4 sm:$0xff]   ;;  %v2684_v52 = vld [vmem:[#allocation5 + $0x36c] ss:$16 sps:$4 sm:$0xff]  }
  0xa3   :  { %1469 = vmatpush1.bf16.msra.mxu1 %v2613_v55  ;;  %v2682_v55 = vld [vmem:[#allocation5 + $0x368] ss:$16 sps:$4 sm:$0xff]  }
  0xa4   :  { %1387 = vmatpush1.bf16.msra.mxu0 %v2610_v54  ;;  %1470 = vmatprep.subr.bf16.mxu1 %v2621_v57  ;;  %v2765_v54 = vld [vmem:[#allocation7 + $0x54] ss:$8 sps:$4 sm:$0xff]  }
  0xa5   :  { %1388 = vmatprep.subr.bf16.mxu0 %v2618_v56  ;;  %v2763_v56 = vld [vmem:[#allocation7 + $0x50] ss:$8 sps:$4 sm:$0xff]   ;;  %v2687_v57 = vld [vmem:[#allocation5 + $0x38c] ss:$16 sps:$4 sm:$0xff]  }
  0xa7   :  { %1471 = vmatpush1.bf16.msra.mxu1 %v2619_v59  ;;  %v2685_v59 = vld [vmem:[#allocation5 + $0x388] ss:$16 sps:$4 sm:$0xff]  }
  0xa8   :  { %1389 = vmatpush1.bf16.msra.mxu0 %v2616_v58  ;;  %1472 = vmatprep.subr.bf16.mxu1 %v2627_v61  ;;  %v2768_v58 = vld [vmem:[#allocation7 + $0x64] ss:$8 sps:$4 sm:$0xff]  }
  0xa9   :  { %1390 = vmatprep.subr.bf16.mxu0 %v2624_v60  ;;  %v2766_v60 = vld [vmem:[#allocation7 + $0x60] ss:$8 sps:$4 sm:$0xff]   ;;  %v2690_v61 = vld [vmem:[#allocation5 + $0x3ac] ss:$16 sps:$4 sm:$0xff]  }
  0xab   :  { %1473 = vmatpush1.bf16.msra.mxu1 %v2625_v63  ;;  %v2688_v63 = vld [vmem:[#allocation5 + $0x3a8] ss:$16 sps:$4 sm:$0xff]  }
  0xac   :  { %1391 = vmatpush1.bf16.msra.mxu0 %v2622_v62  ;;  %1474 = vmatprep.subr.bf16.mxu1 %v2633_v1  ;;  %v2771_v62 = vld [vmem:[#allocation7 + $0x74] ss:$8 sps:$4 sm:$0xff]  }
  0xad   :  { %1392 = vmatprep.subr.bf16.mxu0 %v2630_v0  ;;  %v2769_v0 = vld [vmem:[#allocation7 + $0x70] ss:$8 sps:$4 sm:$0xff]   ;;  %v2693_v1 = vld [vmem:[#allocation5 + $0x3cc] ss:$16 sps:$4 sm:$0xff]  }
  0xaf   :  { %1475 = vmatpush1.bf16.msra.mxu1 %v2631_v3  ;;  %v2691_v3 = vld [vmem:[#allocation5 + $0x3c8] ss:$16 sps:$4 sm:$0xff]  }
  0xb0   :  { %1393 = vmatpush1.bf16.msra.mxu0 %v2628_v2  ;;  %1476 = vmatprep.subr.bf16.mxu1 %v2639_v5  ;;  %v2774_v2 = vld [vmem:[#allocation7 + $0x84] ss:$8 sps:$4 sm:$0xff]  }
  0xb1   :  { %1394 = vmatprep.subr.bf16.mxu0 %v2636_v4  ;;  %v2772_v4 = vld [vmem:[#allocation7 + $0x80] ss:$8 sps:$4 sm:$0xff]   ;;  %v2696_v5 = vld [vmem:[#allocation5 + $0x3ec] ss:$16 sps:$4 sm:$0xff]  }
  0xb3   :  { %1477 = vmatpush1.bf16.msra.mxu1 %v2637_v7  ;;  %v2694_v7 = vld [vmem:[#allocation5 + $0x3e8] ss:$16 sps:$4 sm:$0xff]  }
  0xb4   :  { %1395 = vmatpush1.bf16.msra.mxu0 %v2634_v6  ;;  %1478 = vmatprep.subr.bf16.mxu1 %v2645_v10  ;;  %v2777_v6 = vld [vmem:[#allocation7 + $0x94] ss:$8 sps:$4 sm:$0xff]  }
  0xb5   :  { %1396 = vmatprep.subr.bf16.mxu0 %v2642_v8  ;;  %v2775_v8 = vld [vmem:[#allocation7 + $0x90] ss:$8 sps:$4 sm:$0xff]   ;;  %v2699_v10 = vld [vmem:[#allocation5 + $0x40c] ss:$16 sps:$4 sm:$0xff]  }
  0xb7   :  { %1479 = vmatpush1.bf16.msra.mxu1 %v2643_v13  ;;  %v2697_v13 = vld [vmem:[#allocation5 + $0x408] ss:$16 sps:$4 sm:$0xff]  }
  0xb8   :  { %1397 = vmatpush1.bf16.msra.mxu0 %v2640_v11  ;;  %1489 = vmatprep.subr.bf16.mxu1 %v2648_v15  ;;  %v2780_v11 = vld [vmem:[#allocation7 + $0xa4] ss:$8 sps:$4 sm:$0xff]   ;;  %v2778_v15 = vld [vmem:[#allocation7 + $0xa0] ss:$8 sps:$4 sm:$0xff]  }
  0xb9   :  { %1407 = vmatprep.subr.bf16.mxu0 %v2654_v16  ;;  %v2783_v16 = vld [vmem:[#allocation7 + $0xb4] ss:$8 sps:$4 sm:$0xff]  }
  0xba   :  { %1481 = vmatmul.mubr.bf16.vlgmr.msra.gmra.mrb[4].mxu1 %v3011_v9  ;;  %v2661_v9 = vld [vmem:[#allocation5 + $0x288] ss:$16 sps:$4 sm:$0xff]  }
  0xbb   :  { %1399 = vmatmul.mubr.bf16.vlgmr.msra.gmra.mrb[0].mxu0 %v3021_v17  ;;  %1490 = vmatpush1.bf16.msra.mxu1 %v2646_v18  ;;  %v2700_v18 = vld [vmem:[#allocation5 + $0x428] ss:$16 sps:$4 sm:$0xff]  }
  0xbc   :  { %1408 = vmatpush1.bf16.msra.mxu0 %v2652_v19  ;;  %1491 = vmatprep.subr.bf16.mxu1 %v2651_v20  ;;  %v2705_v19 = vld [vmem:[#allocation5 + $0x44c] ss:$16 sps:$4 sm:$0xff]   ;;  %v2781_v20 = vld [vmem:[#allocation7 + $0xb0] ss:$8 sps:$4 sm:$0xff]  }
  0xbd   :  { %1439 = vmatprep.mubr.bf16.mxu0 %v2925_v23  ;;  %1521 = vmatprep.mubr.bf16.mxu1 %v3007_v53  ;;  %v2667_v53 = vld [vmem:[#allocation5 + $0x2c8] ss:$16 sps:$4 sm:$0xff]  }
  0xbe   :  { %2024 = vmatprep.subr.bf16.mxu0 %v2750_v35  ;;  %v2721_v35 = vld [vmem:[#allocation5 + $0x508] ss:$16 sps:$4 sm:$0xff]  }
  0xbf   :  { %1492 = vmatpush1.bf16.msra.mxu1 %v2649_v21  ;;  %v2786_v21 = vld [vmem:[#allocation7 + $0xc4] ss:$8 sps:$4 sm:$0xff]  }
  0xc0   :  { %1493 = vmatprep.subr.bf16.mxu1 %v2657_v22  ;;  %v2703_v22 = vld [vmem:[#allocation5 + $0x448] ss:$16 sps:$4 sm:$0xff]  }
  0xc3   :  { %1494 = vmatpush1.bf16.msra.mxu1 %v2655_v24  ;;  %v2708_v24 = vld [vmem:[#allocation5 + $0x46c] ss:$16 sps:$4 sm:$0xff]  }
  0xc4   :  { %1495 = vmatprep.subr.bf16.mxu1 %v2660_v26  ;;  %v2789_v26 = vld [vmem:[#allocation7 + $0xd4] ss:$8 sps:$4 sm:$0xff]  }
  0xc7   :  { %2347 = vmatmul.mubr.msk.bf16.vlgmr.msra.gmra.mrb[0].mxu0 %vm1280_vm0, %v3027_v28  ;;  %1496 = vmatpush1.bf16.msra.mxu1 %v2658_v27  ;;  %v2711_v27 = vld [vmem:[#allocation5 + $0x48c] ss:$16 sps:$4 sm:$0xff]  }
  0xc8   :  { %1497 = vmatprep.subr.bf16.mxu1 %v2663_v29  ;;  %2025 = vmatpush1.bf16.msra.mxu0 %v2748_v34  ;;  %v2709_v29 = vld [vmem:[#allocation5 + $0x488] ss:$16 sps:$4 sm:$0xff]   ;;  %v2723_v34 = vld [vmem:[#allocation5 + $0x50c] ss:$16 sps:$4 sm:$0xff]  }
  0xc9   :  { %2026 = vmatprep.subr.bf16.mxu0 %v2753_v37  ;;  %v2726_v37 = vld [vmem:[#allocation5 + $0x52c] ss:$16 sps:$4 sm:$0xff]  }
  0xcb   :  { %1498 = vmatpush1.bf16.msra.mxu1 %v2661_v9  ;;  %v2714_v9 = vld [vmem:[#allocation5 + $0x4ac] ss:$16 sps:$4 sm:$0xff]  }
  0xcc   :  { %1499 = vmatprep.subr.bf16.mxu1 %v2666_v30  ;;  %2027 = vmatpush1.bf16.msra.mxu0 %v2751_v39  ;;  %v2712_v30 = vld [vmem:[#allocation5 + $0x4a8] ss:$16 sps:$4 sm:$0xff]  }
  0xcd   :  { %2028 = vmatprep.subr.bf16.mxu0 %v2756_v41  ;;  %v2790_v39 = vld [vmem:[#allocation7 + $0xe0] ss:$8 sps:$4 sm:$0xff]   ;;  %v2729_v41 = vld [vmem:[#allocation5 + $0x54c] ss:$16 sps:$4 sm:$0xff]  }
  0xcf   :  { %1500 = vmatpush1.bf16.msra.mxu1 %v2664_v31  ;;  %v2717_v31 = vld [vmem:[#allocation5 + $0x4cc] ss:$16 sps:$4 sm:$0xff]  }
  0xd0   :  { %1501 = vmatprep.subr.bf16.mxu1 %v2669_v32  ;;  %2029 = vmatpush1.bf16.msra.mxu0 %v2754_v43  ;;  %v2715_v32 = vld [vmem:[#allocation5 + $0x4c8] ss:$16 sps:$4 sm:$0xff]  }
  0xd1   :  { %2030 = vmatprep.subr.bf16.mxu0 %v2759_v45  ;;  %v2793_v43 = vld [vmem:[#allocation7 + $0xf0] ss:$8 sps:$4 sm:$0xff]   ;;  %v2732_v45 = vld [vmem:[#allocation5 + $0x56c] ss:$16 sps:$4 sm:$0xff]  }
  0xd3   :  { %1502 = vmatpush1.bf16.msra.mxu1 %v2667_v53  ;;  %v2720_v53 = vld [vmem:[#allocation5 + $0x4ec] ss:$16 sps:$4 sm:$0xff]  }
  0xd4   :  { %1503 = vmatprep.subr.bf16.mxu1 %v2672_v33  ;;  %2031 = vmatpush1.bf16.msra.mxu0 %v2757_v47  ;;  %v2718_v33 = vld [vmem:[#allocation5 + $0x4e8] ss:$16 sps:$4 sm:$0xff]   ;;  %v2798_v47 = vld [vmem:[#allocation7 + $0x104] ss:$8 sps:$4 sm:$0xff]  }
  0xd5   :  { %2032 = vmatprep.subr.bf16.mxu0 %v2762_v49  ;;  %v2733_v49 = vld [vmem:[#allocation5 + $0x588] ss:$16 sps:$4 sm:$0xff]  }
  0xd7   :  { %1504 = vmatpush1.bf16.msra.mxu1 %v2670_v38  ;;  %v2792_v38 = vld [vmem:[#allocation7 + $0xe4] ss:$8 sps:$4 sm:$0xff]  }
  0xd8   :  { %1505 = vmatprep.subr.bf16.mxu1 %v2675_v40  ;;  %2033 = vmatpush1.bf16.msra.mxu0 %v2760_v51  ;;  %v2724_v40 = vld [vmem:[#allocation5 + $0x528] ss:$16 sps:$4 sm:$0xff]  }
  0xd9   :  { %2034 = vmatprep.subr.bf16.mxu0 %v2765_v54  ;;  %v2736_v51 = vld [vmem:[#allocation5 + $0x5a8] ss:$16 sps:$4 sm:$0xff]  }
  0xda   :  { %v2739_v54 = vld [vmem:[#allocation5 + $0x5c8] ss:$16 sps:$4 sm:$0xff]  }
  0xdb   :  { %1506 = vmatpush1.bf16.msra.mxu1 %v2673_v42  ;;  %v2795_v42 = vld [vmem:[#allocation7 + $0xf4] ss:$8 sps:$4 sm:$0xff]  }
  0xdc   :  { %1507 = vmatprep.subr.bf16.mxu1 %v2678_v44  ;;  %2035 = vmatpush1.bf16.msra.mxu0 %v2763_v56  ;;  %v2727_v44 = vld [vmem:[#allocation5 + $0x548] ss:$16 sps:$4 sm:$0xff]  }
  0xdd   :  { %2036 = vmatprep.subr.bf16.mxu0 %v2768_v58  ;;  %v2742_v56 = vld [vmem:[#allocation5 + $0x5e8] ss:$16 sps:$4 sm:$0xff]  }
  0xde   :  { %v2745_v58 = vld [vmem:[#allocation5 + $0x608] ss:$16 sps:$4 sm:$0xff]  }
  0xdf   :  { %1508 = vmatpush1.bf16.msra.mxu1 %v2676_v46  ;;  %v2730_v46 = vld [vmem:[#allocation5 + $0x568] ss:$16 sps:$4 sm:$0xff]  }
  0xe0   :  { %1509 = vmatprep.subr.bf16.mxu1 %v2681_v48  ;;  %2037 = vmatpush1.bf16.msra.mxu0 %v2766_v60  ;;  %v2735_v48 = vld [vmem:[#allocation5 + $0x58c] ss:$16 sps:$4 sm:$0xff]  }
  0xe1   :  { %2038 = vmatprep.subr.bf16.mxu0 %v2771_v62 }
  0xe3   :  { %1510 = vmatpush1.bf16.msra.mxu1 %v2679_v50  ;;  %v2738_v50 = vld [vmem:[#allocation5 + $0x5ac] ss:$16 sps:$4 sm:$0xff]  }
  0xe4   :  { %1511 = vmatprep.subr.bf16.mxu1 %v2684_v52  ;;  %2039 = vmatpush1.bf16.msra.mxu0 %v2769_v0  ;;  %v2741_v52 = vld [vmem:[#allocation5 + $0x5cc] ss:$16 sps:$4 sm:$0xff]  }
  0xe5   :  { %2040 = vmatprep.subr.bf16.mxu0 %v2774_v2 }
  0xe7   :  { %1512 = vmatpush1.bf16.msra.mxu1 %v2682_v55  ;;  %v2744_v55 = vld [vmem:[#allocation5 + $0x5ec] ss:$16 sps:$4 sm:$0xff]  }
  0xe8   :  { %1513 = vmatprep.subr.bf16.mxu1 %v2687_v57  ;;  %2041 = vmatpush1.bf16.msra.mxu0 %v2772_v4  ;;  %v2747_v57 = vld [vmem:[#allocation5 + $0x60c] ss:$16 sps:$4 sm:$0xff]  }
  0xe9   :  { %2042 = vmatprep.subr.bf16.mxu0 %v2777_v6 }
  0xeb   :  { %1514 = vmatpush1.bf16.msra.mxu1 %v2685_v59 }
  0xec   :  { %1515 = vmatprep.subr.bf16.mxu1 %v2690_v61  ;;  %2043 = vmatpush1.bf16.msra.mxu0 %v2775_v8 }
  0xed   :  { %2044 = vmatprep.subr.bf16.mxu0 %v2780_v11 }
  0xef   :  { %1516 = vmatpush1.bf16.msra.mxu1 %v2688_v63  ;;  %v280_v63 = vlaneseq }
  0xf0   :  { %1517 = vmatprep.subr.bf16.mxu1 %v2693_v1  ;;  %2045 = vmatpush1.bf16.msra.mxu0 %v2778_v15 }
  0xf1   :  { %2046 = vmatprep.subr.bf16.mxu0 %v2783_v16  ;;  %v3037_v0 = vshrl.u32 %v280_v63, 7 }
  0xf3   :  { %1518 = vmatpush1.bf16.msra.mxu1 %v2691_v3  ;;  %v3040_v1 = vsub.s32 0, %v3037_v0 }
  0xf4   :  { %1519 = vmatprep.subr.bf16.mxu1 %v2696_v5  ;;  %2047 = vmatpush1.bf16.msra.mxu0 %v2781_v20 }
  0xf5   :  { %2048 = vmatprep.subr.bf16.mxu0 %v2786_v21  ;;  %v2801_v21 = vld [vmem:[#allocation7 + $0x114] ss:$8 sps:$4 sm:$0xff]  }
  0xf7   :  { %1520 = vmatpush1.bf16.msra.mxu1 %v2694_v7 }
  0xf8   :  { %1530 = vmatprep.subr.bf16.mxu1 %v2699_v10  ;;  %2049 = vmatpush1.bf16.msra.mxu0 %v2784_v25  ;;  %v2802_v25 = vld [vmem:[#allocation7 + $0x120] ss:$8 sps:$4 sm:$0xff]  }
  0xf9   :  { %2050 = vmatprep.subr.bf16.mxu0 %v2789_v26  ;;  %v2807_v26 = vld [vmem:[#allocation7 + $0x134] ss:$8 sps:$4 sm:$0xff]  }
  0xfa   :  { %1522 = vmatmul.mubr.bf16.vlgmr.msra.gmra.mrb[4].mxu1 %v3013_v12  ;;  %v2706_v12 = vld [vmem:[#allocation5 + $0x468] ss:$16 sps:$4 sm:$0xff]  }
  0xfb   :  { %1531 = vmatpush1.bf16.msra.mxu1 %v2697_v13  ;;  %1562 = vmatprep.mubr.bf16.mxu1 %v3018_v36  ;;  %v2787_v36 = vld [vmem:[#allocation7 + $0xd0] ss:$8 sps:$4 sm:$0xff]  }
  0xfc   :  { %1532 = vmatprep.subr.bf16.mxu1 %v2702_v14  ;;  %2051 = vmatpush1.bf16.msra.mxu0 %v2787_v36  ;;  %v2808_v36 = vld [vmem:[#allocation7 + $0x140] ss:$8 sps:$4 sm:$0xff]  }
  0xfd   :  { %2052 = vmatprep.subr.bf16.mxu0 %v2792_v38  ;;  %v2828_v38 = vld [vmem:[#allocation7 + $0x1a4] ss:$8 sps:$4 sm:$0xff]  }
  0xff   :  { %1533 = vmatpush1.bf16.msra.mxu1 %v2700_v18 }
 0x100   :  { %1534 = vmatprep.subr.bf16.mxu1 %v2705_v19  ;;  %2053 = vmatpush1.bf16.msra.mxu0 %v2790_v39  ;;  %v2796_v19 = vld [vmem:[#allocation7 + $0x100] ss:$8 sps:$4 sm:$0xff]  }
 0x101   :  { %2054 = vmatprep.subr.bf16.mxu0 %v2795_v42  ;;  %v2826_v39 = vld [vmem:[#allocation7 + $0x1a0] ss:$8 sps:$4 sm:$0xff]   ;;  %v2834_v42 = vld [vmem:[#allocation7 + $0x1c4] ss:$8 sps:$4 sm:$0xff]  }
 0x103   :  { %1535 = vmatpush1.bf16.msra.mxu1 %v2703_v22  ;;  %v2799_v22 = vld [vmem:[#allocation7 + $0x110] ss:$8 sps:$4 sm:$0xff]  }
 0x104   :  { %1536 = vmatprep.subr.bf16.mxu1 %v2708_v24  ;;  %2055 = vmatpush1.bf16.msra.mxu0 %v2793_v43  ;;  %v2804_v24 = vld [vmem:[#allocation7 + $0x124] ss:$8 sps:$4 sm:$0xff]   ;;  %v2832_v43 = vld [vmem:[#allocation7 + $0x1c0] ss:$8 sps:$4 sm:$0xff]  }
 0x105   :  { %2065 = vmatprep.subr.bf16.mxu0 %v2798_v47  ;;  %v2838_v47 = vld [vmem:[#allocation7 + $0x1e0] ss:$8 sps:$4 sm:$0xff]  }
 0x107   :  { %1537 = vmatpush1.bf16.msra.mxu1 %v2706_v12  ;;  %v2805_v12 = vld [vmem:[#allocation7 + $0x130] ss:$8 sps:$4 sm:$0xff]  }
 0x108   :  { %1538 = vmatprep.subr.bf16.mxu1 %v2711_v27  ;;  %v2810_v27 = vld [vmem:[#allocation7 + $0x144] ss:$8 sps:$4 sm:$0xff]  }
 0x10b   :  { %1539 = vmatpush1.bf16.msra.mxu1 %v2709_v29  ;;  %v2813_v29 = vld [vmem:[#allocation7 + $0x154] ss:$8 sps:$4 sm:$0xff]  }
 0x10c   :  { %1540 = vmatprep.subr.bf16.mxu1 %v2714_v9  ;;  %v2811_v9 = vld [vmem:[#allocation7 + $0x150] ss:$8 sps:$4 sm:$0xff]  }
 0x10f   :  { %1541 = vmatpush1.bf16.msra.mxu1 %v2712_v30  ;;  %v2816_v30 = vld [vmem:[#allocation7 + $0x164] ss:$8 sps:$4 sm:$0xff]  }
 0x110   :  { %1542 = vmatprep.subr.bf16.mxu1 %v2717_v31  ;;  %v2814_v31 = vld [vmem:[#allocation7 + $0x160] ss:$8 sps:$4 sm:$0xff]  }
 0x113   :  { %1543 = vmatpush1.bf16.msra.mxu1 %v2715_v32  ;;  %v2819_v32 = vld [vmem:[#allocation7 + $0x174] ss:$8 sps:$4 sm:$0xff]  }
 0x114   :  { %1544 = vmatprep.subr.bf16.mxu1 %v2720_v53  ;;  %v2817_v53 = vld [vmem:[#allocation7 + $0x170] ss:$8 sps:$4 sm:$0xff]  }
 0x117   :  { %1545 = vmatpush1.bf16.msra.mxu1 %v2718_v33  ;;  %v2822_v33 = vld [vmem:[#allocation7 + $0x184] ss:$8 sps:$4 sm:$0xff]  }
 0x118   :  { %1546 = vmatprep.subr.bf16.mxu1 %v2723_v34  ;;  %v2820_v34 = vld [vmem:[#allocation7 + $0x180] ss:$8 sps:$4 sm:$0xff]  }
 0x11b   :  { %1547 = vmatpush1.bf16.msra.mxu1 %v2721_v35  ;;  %v2825_v35 = vld [vmem:[#allocation7 + $0x194] ss:$8 sps:$4 sm:$0xff]  }
 0x11c   :  { %1548 = vmatprep.subr.bf16.mxu1 %v2726_v37  ;;  %v2823_v37 = vld [vmem:[#allocation7 + $0x190] ss:$8 sps:$4 sm:$0xff]  }
 0x11f   :  { %1549 = vmatpush1.bf16.msra.mxu1 %v2724_v40  ;;  %v2831_v40 = vld [vmem:[#allocation7 + $0x1b4] ss:$8 sps:$4 sm:$0xff]  }
 0x120   :  { %1550 = vmatprep.subr.bf16.mxu1 %v2729_v41  ;;  %v2829_v41 = vld [vmem:[#allocation7 + $0x1b0] ss:$8 sps:$4 sm:$0xff]  }
 0x123   :  { %1551 = vmatpush1.bf16.msra.mxu1 %v2727_v44  ;;  %v2837_v44 = vld [vmem:[#allocation7 + $0x1d4] ss:$8 sps:$4 sm:$0xff]  }
 0x124   :  { %1552 = vmatprep.subr.bf16.mxu1 %v2732_v45  ;;  %v2835_v45 = vld [vmem:[#allocation7 + $0x1d0] ss:$8 sps:$4 sm:$0xff]  }
 0x127   :  { %1553 = vmatpush1.bf16.msra.mxu1 %v2730_v46  ;;  %v2840_v46 = vld [vmem:[#allocation7 + $0x1e4] ss:$8 sps:$4 sm:$0xff]  }
 0x128   :  { %1554 = vmatprep.subr.bf16.mxu1 %v2735_v48  ;;  %v2843_v48 = vld [vmem:[#allocation7 + $0x1f4] ss:$8 sps:$4 sm:$0xff]  }
 0x12b   :  { %1555 = vmatpush1.bf16.msra.mxu1 %v2733_v49  ;;  %v2841_v49 = vld [vmem:[#allocation7 + $0x1f0] ss:$8 sps:$4 sm:$0xff]  }
 0x12c   :  { %1556 = vmatprep.subr.bf16.mxu1 %v2738_v50  ;;  %v290_v50 = vsub.s32 2, %v3037_v0 }
 0x12f   :  { %1557 = vmatpush1.bf16.msra.mxu1 %v2736_v51  ;;  %v294_v51 = vsub.s32 3, %v3037_v0 }
 0x130   :  { %1558 = vmatprep.subr.bf16.mxu1 %v2741_v52 }
 0x133   :  { %1559 = vmatpush1.bf16.msra.mxu1 %v2739_v54 }
 0x134   :  { %1560 = vmatprep.subr.bf16.mxu1 %v2744_v55 }
 0x137   :  { %1561 = vmatpush1.bf16.msra.mxu1 %v2742_v56 }
 0x138   :  { %1571 = vmatprep.subr.bf16.mxu1 %v2747_v57 }
 0x13a   :  { %1563 = vmatmul.mubr.bf16.vlgmr.msra.gmra.mrb[4].mxu1 %v3021_v17  ;;  %v3045_v17 = vld [vmem:[%s3073_s2] sm:$0xf] }
 0x13b   :  { %1572 = vmatpush1.bf16.msra.mxu1 %v2745_v58  ;;  %1603 = vmatprep.mubr.bf16.mxu1 %v2925_v23  ;;  %v3048_v23 = vsub.s32 1, %v3037_v0  ;;  %v291_v52 = vrot.slane %v3045_v17, %v290_v50  ;;  %v295_v54 = vrot.slane %v3045_v17, %v294_v51  ;;  %v1692_v0 = vld [vmem:[%s3075_s4] sm:$0x3] }
 0x13d   :  { %v287_v2 = vrot.slane %v3045_v17, %v3048_v23 }
 0x146   :  { %2348 = vmatmul.mubr.msk.bf16.vlgmr.msra.gmra.mrb[4].mxu1 %vm1280_vm0, %v3027_v28  ;;  %v283_v28 = vrot.slane %v3045_v17, %v3040_v1  ;;  %v1697_v17 = vrot.slane %v1692_v0, %v3040_v1 }
 0x14d   :  { %v1318_v59 = vpop.f32.mrb[0].mxu1 }
 0x14e   :  { %v1320_v60 = vpop.f32.mrb[1].mxu1  ;;  %v1319_v3 = vadd.f32 %v1318_v59, %v283_v28 }
 0x14f   :  { %v1322_v61 = vpop.f32.mrb[2].mxu1  ;;  %v1321_v4 = vadd.f32 %v1320_v60, %v287_v2 }
 0x150   :  { %v1323_v62 = vpop.f32.mrb[3].mxu1 }
 0x19a   :  { %v1441_v5 = vpop.f32.mrb[0].mxu0 }
 0x19b   :  { %v2415_v6 = vadd.f32 %v1441_v5, %v1319_v3  ;;  %v1443_v7 = vpop.f32.mrb[1].mxu0  ;;  %v2112_v5 = vld [vmem:[%s3076_s5] sm:$0x3] }
 0x19c   :  { %v2417_v8 = vadd.f32 %v1443_v7, %v1321_v4  ;;  %v1445_v10 = vpop.f32.mrb[2].mxu0  ;;  %v1701_v4 = vrot.slane %v1692_v0, %v3048_v23 }
 0x19d   :  { %vm1612_vm1 = vcmp.gt.f32.partialorder %v2415_v6, 0.0  ;;  %v1616_v11 = vmul.f32 0.2, %v2415_v6  ;;  %v1446_v13 = vpop.f32.mrb[3].mxu0 }
 0x19e   :  { %vm1613_vm2 = vcmp.gt.f32.partialorder %v2417_v8, 0.0  ;;  %v1617_v14 = vmul.f32 0.2, %v2417_v8  ;;  %v2117_v13 = vrot.slane %v2112_v5, %v3040_v1 }
 0x19f   :  { %v1620_v15 = vsel %vm1612_vm1, %v2415_v6, %v1616_v11 }
 0x1a0   :  { %v1621_v16 = vsel %vm1613_vm2, %v2417_v8, %v1617_v14  ;;  %v1624_v20 = vpack.c.bf16 %v1620_v15, %v1620_v15 }
 0x1a1   :  { %v1625_v18 = vpack.c.bf16 %v1621_v16, %v1621_v16  ;;  %v2121_v16 = vrot.slane %v2112_v5, %v3048_v23 }
 0x1a3   :  { %2056 = vmatprep.mubr.bf16.mxu0 %v1625_v18 }
 0x1a4   :  { %2057 = vmatmul.mubr.bf16.vlgmr.msra.gmra.mrb[4].mxu0 %v1624_v20 }
 0x1a5   :  { %2066 = vmatpush1.bf16.msra.mxu0 %v2796_v19 }
 0x1a6   :  { %2067 = vmatprep.subr.bf16.mxu0 %v2801_v21 }
 0x1a9   :  { %2068 = vmatpush1.bf16.msra.mxu0 %v2799_v22 }
 0x1aa   :  { %2069 = vmatprep.subr.bf16.mxu0 %v2804_v24 }
 0x1ad   :  { %2070 = vmatpush1.bf16.msra.mxu0 %v2802_v25  ;;  %v2413_v25 = vld [vmem:[#allocation2] ss:$0 sm:$0xff] }
 0x1ae   :  { %2071 = vmatprep.subr.bf16.mxu0 %v2807_v26 }
 0x1b1   :  { %2072 = vmatpush1.bf16.msra.mxu0 %v2805_v12 }
 0x1b2   :  { %2073 = vmatprep.subr.bf16.mxu0 %v2810_v27 }
 0x1b5   :  { %2074 = vmatpush1.bf16.msra.mxu0 %v2808_v36 }
 0x1b6   :  { %2075 = vmatprep.subr.bf16.mxu0 %v2813_v29 }
 0x1b9   :  { %2076 = vmatpush1.bf16.msra.mxu0 %v2811_v9 }
 0x1ba   :  { %2077 = vmatprep.subr.bf16.mxu0 %v2816_v30 }
 0x1bd   :  { %2078 = vmatpush1.bf16.msra.mxu0 %v2814_v31 }
 0x1be   :  { %2079 = vmatprep.subr.bf16.mxu0 %v2819_v32 }
 0x1c1   :  { %2080 = vmatpush1.bf16.msra.mxu0 %v2817_v53 }
 0x1c2   :  { %2081 = vmatprep.subr.bf16.mxu0 %v2822_v33 }
 0x1c5   :  { %2082 = vmatpush1.bf16.msra.mxu0 %v2820_v34 }
 0x1c6   :  { %2083 = vmatprep.subr.bf16.mxu0 %v2825_v35 }
 0x1c9   :  { %2084 = vmatpush1.bf16.msra.mxu0 %v2823_v37 }
 0x1ca   :  { %2085 = vmatprep.subr.bf16.mxu0 %v2828_v38 }
 0x1cd   :  { %2086 = vmatpush1.bf16.msra.mxu0 %v2826_v39 }
 0x1ce   :  { %2087 = vmatprep.subr.bf16.mxu0 %v2831_v40 }
 0x1d1   :  { %2088 = vmatpush1.bf16.msra.mxu0 %v2829_v41 }
 0x1d2   :  { %2089 = vmatprep.subr.bf16.mxu0 %v2834_v42 }
 0x1d5   :  { %2090 = vmatpush1.bf16.msra.mxu0 %v2832_v43 }
 0x1d6   :  { %2091 = vmatprep.subr.bf16.mxu0 %v2837_v44 }
 0x1d9   :  { %2092 = vmatpush1.bf16.msra.mxu0 %v2835_v45 }
 0x1da   :  { %2093 = vmatprep.subr.bf16.mxu0 %v2840_v46 }
 0x1dd   :  { %2094 = vmatpush1.bf16.msra.mxu0 %v2838_v47 }
 0x1de   :  { %2095 = vmatprep.subr.bf16.mxu0 %v2843_v48 }
 0x1e1   :  { %2096 = vmatpush1.bf16.msra.mxu0 %v2841_v49 }
 0x219   :  { %v1605_v55 = vpop.f32.mrb[4].mxu1 }
 0x21a   :  { %v2418_v56 = vadd.f32 %v1605_v55, %v291_v52  ;;  %v1607_v57 = vpop.f32.mrb[5].mxu1 }
 0x21b   :  { %v2419_v58 = vadd.f32 %v1607_v57, %v295_v54  ;;  %v1609_v59 = vpop.f32.mrb[6].mxu1 }
 0x21c   :  { %vm1614_vm3 = vcmp.gt.f32.partialorder %v2418_v56, 0.0  ;;  %v1618_v60 = vmul.f32 0.2, %v2418_v56  ;;  %v1610_v61 = vpop.f32.mrb[7].mxu1 }
 0x21d   :  { %vm1615_vm4 = vcmp.gt.f32.partialorder %v2419_v58, 0.0  ;;  %v1619_v62 = vmul.f32 0.2, %v2419_v58 }
 0x21e   :  { %v1622_v63 = vsel %vm1614_vm3, %v2418_v56, %v1618_v60 }
 0x21f   :  { %v1623_v28 = vsel %vm1615_vm4, %v2419_v58, %v1619_v62  ;;  %v1626_v3 = vpack.c.bf16 %v1622_v63, %v1622_v63 }
 0x220   :  { %v1627_v2 = vpack.c.bf16 %v1623_v28, %v1623_v28 }
 0x222   :  { %2097 = vmatprep.mubr.bf16.mxu0 %v1627_v2 }
 0x223   :  { %2098 = vmatmul.mubr.bf16.vlgmr.msra.gmra.mrb[4].mxu0 %v1626_v3 }
 0x2f6   :  { %v2099_v6 = vpop.f32.mrb[4].mxu0 }
 0x2f7   :  { %v2420_v7 = vadd.f32 %v2099_v6, %v1697_v17  ;;  %v2101_v8 = vpop.f32.mrb[5].mxu0 }
 0x2f8   :  { %v2421_v10 = vadd.f32 %v2101_v8, %v1701_v4  ;;  %v2103_v11 = vpop.f32.mrb[6].mxu0 }
 0x2f9   :  { %vm2106_vm5 = vcmp.gt.f32.partialorder %v2420_v7, 0.0  ;;  %v2108_v14 = vmul.f32 0.2, %v2420_v7  ;;  %v2104_v15 = vpop.f32.mrb[7].mxu0 }
 0x2fa   :  { %vm2107_vm6 = vcmp.gt.f32.partialorder %v2421_v10, 0.0  ;;  %v2109_v18 = vmul.f32 0.2, %v2421_v10 }
 0x2fb   :  { %v2110_v19 = vsel %vm2106_vm5, %v2420_v7, %v2108_v14 }
 0x2fc   :  { %v2111_v20 = vsel %vm2107_vm6, %v2421_v10, %v2109_v18  ;;  %v2124_v21 = vmul.f32 %v2117_v13, %v2110_v19 }
 0x2fd   :  { %v2125_v22 = vmul.f32 %v2121_v16, %v2111_v20 }
 0x2ff   :  { %v2126_v24 = vadd.f32 %v2125_v22, %v2124_v21 }
 0x301   :  { %2127 = vadd.xlane.f32.xlu0 %v2126_v24 }
 0x38e   :  { %v2128_v26 = vpop.xlane.xlu0 %2127 }
 0x38f   :  { %v2136_v12 = vadd.f32 %v2413_v25, %v2128_v26 }
 0x391   :  { %v2137_v27 = vsub.f32 0.0, %v2136_v12 }
 0x393   :  { %v2138_v36 = vmul.f32 1.442695, %v2137_v27 }
 0x395   :  { %2844 = vpow2.f32 %v2138_v36 }
 0x39f   :  { %v2845_v1 = vpop.eup %2844 }
 0x3a0   :  { %v2140_v29 = vadd.f32 1.0, %v2845_v1 }
 0x3a2   :  { %2846 = vrcp.f32 %v2140_v29 }
 0x3ac   :  { %v2847_v9 = vpop.eup %2846 }
 0x3ad   :  { %2144 = vst.msk [vmem:[%s3078_s7] sm:$0xff] %vm2143_vm7, %v2847_v9 }
 0x3ae   :  { %2149 = vsyncpa [#allocation4], 1 }
 0x3af   :  { %2150 = vsyncpa [#allocation6], 1 }

</bundles_post_ra>
